<compile_context>
chip_gen: v5e
topology: v5e:2x2
jax: 0.10.0
libtpu: 0.0.40
codegen_flags: <defaults>
</compile_context>

<pallas_src>
import jax
import jax.numpy as jnp
from jax.experimental import pallas as pl
from jax.experimental.pallas import tpu as pltpu


def _make_rel_lv_kernel(steps: int, tile_t: int, n_rows: int):
    """Build the fused Rel_LV kernel, specialized on a static `steps`."""
    needs_mask = steps < n_rows

    def kernel(x_ref, at_ref, g_ref, y_ref, xnew_ref):
        x = x_ref[...]                                   # (tile_t, N) f32
        a_t = at_ref[...]                                # (N, N) f32  == A^T
        g1 = g_ref[...] + 1.0                            # (1, N)

        # inter[t, j] = sum_k x[t, k] * A[j, k] == (A @ x[t])_j
        # A^T is prepared in the wrapper -> canonical [M,K]x[K,N] MXU matmul.
        inter = jnp.dot(x, a_t, preferred_element_type=jnp.float32)

        # x*(A@x) + x*(g+1) == x*(A@x + g + 1)
        x_upd = x * (inter + g1)

        if needs_mask:
            # Narrow (tile_t, 1) iota; broadcast happens inside the select.
            base = pl.program_id(0) * tile_t
            row = base + jax.lax.broadcasted_iota(jnp.int32, (tile_t, 1), 0)
            x_new = jnp.where(row < steps, x_upd, x)
        else:
            # steps == T: every row updates; skip iota / compare / select.
            x_new = x_upd

        denom = jnp.sum(x_new, axis=1, keepdims=True)    # (tile_t, 1)
        # Exact reciprocal keeps parity with the reference division under the
        # 1e-5 tolerance; use approx=True (EUP vrcp, free slot) if acceptable.
        inv = pl.reciprocal(denom, approx=False)

        xnew_ref[...] = x_new.astype(xnew_ref.dtype)
        y_ref[...] = (x_new * inv).astype(y_ref.dtype)

    return kernel


def rel_lv_forward(x, g, interaction, steps=1, *, tile_t=None,
                   vmem_limit_bytes=None):
    """Fused Rel_LV forward.

    x: (T, N) f32, g: (N,) f32, interaction: (N, N) f32, 0 <= steps <= T.
    Returns (y, x_updated); x_updated mirrors the in-place mutation of the
    PyTorch module (rows [0, steps) replaced). The x input is aliased to
    x_updated, so callers that donate x get true in-place behaviour.
    """
    T, N = x.shape
    assert interaction.shape == (N, N)
    assert g.shape == (N,)
    steps = int(steps)
    assert 0 <= steps <= T

    x32 = x.astype(jnp.float32)
    # Pre-transpose A once in the wrapper so the kernel never transposes the
    # 128x128 weight (no XLU work inside the kernel / per grid step).
    a_t = jnp.transpose(interaction.astype(jnp.float32))
    g2 = g.reshape(1, N).astype(jnp.float32)

    # Row tiling over T. A and g have constant index_maps -> fetched once and
    # kept VMEM-resident across tiles. For large T, size tile_t per
    # generation: v7x has 64 MiB physical VMEM (halve vs v6e), v5e's default
    # scoped limit is 16 MiB -- raise vmem_limit_bytes or shrink tile_t.
    if tile_t is None:
        tile_t = T if T <= 512 else 512
    if tile_t != T:
        tile_t = max(8, (tile_t // 8) * 8)   # (8, 128) block constraint
    grid = (pl.cdiv(T, tile_t),)

    kernel = _make_rel_lv_kernel(steps, tile_t, T)

    cost = pl.CostEstimate(
        flops=2 * T * N * N + 6 * T * N,
        transcendentals=0,
        bytes_accessed=4 * (T * N + N * N + N + 2 * T * N),
    )

    cp_kwargs = dict(dimension_semantics=("parallel",))
    if vmem_limit_bytes is not None:
        cp_kwargs["vmem_limit_bytes"] = int(vmem_limit_bytes)

    y, x_new = pl.pallas_call(
        kernel,
        grid=grid,
        in_specs=[
            pl.BlockSpec((tile_t, N), lambda i: (i, 0)),   # x row tile
            pl.BlockSpec((N, N), lambda i: (0, 0)),        # A^T (resident)
            pl.BlockSpec((1, N), lambda i: (0, 0)),        # g   (resident)
        ],
        out_specs=(
            pl.BlockSpec((tile_t, N), lambda i: (i, 0)),   # y
            pl.BlockSpec((tile_t, N), lambda i: (i, 0)),   # updated x
        ),
        out_shape=(
            jax.ShapeDtypeStruct((T, N), jnp.float32),
            jax.ShapeDtypeStruct((T, N), jnp.float32),
        ),
        input_output_aliases={0: 1},                        # x -> updated x
        compiler_params=pltpu.CompilerParams(**cp_kwargs),
        cost_estimate=cost,
    )(x32, a_t, g2)
    return y, x_new


def _reference_forward(x, g, A, steps):
    """Pure-JAX mirror of the PyTorch forward (row-by-row, in-place style)."""
    xs = x
    for i in range(steps):
        inter = A @ xs[i]                                   # (N,)
        xs = xs.at[i].set(xs[i] * inter + xs[i] * (g + 1.0))
    y = xs / jnp.sum(xs, axis=1, keepdims=True)
    return y, xs


if __name__ == "__main__":
    # Small shapes: 8 state rows of 128 vertices (lane-dense last dim).
    n_vertices = 128
    T = 8

    key = jax.random.PRNGKey(0)
    kx, kg, ka = jax.random.split(key, 3)

    # Parameters initialized like torch.rand(...) -> uniform [0, 1).
    g = jax.random.uniform(kg, (n_vertices,), dtype=jnp.float32)
    A = jax.random.uniform(ka, (n_vertices, n_vertices), dtype=jnp.float32)
    x = jax.random.uniform(kx, (T, n_vertices), dtype=jnp.float32)

    # References computed up-front from the pristine x (the pallas_call never
    # mutates its caller-visible inputs; this ordering is just defensive).
    cases = {s: _reference_forward(x, g, A, s) for s in (3, T)}

    for steps, (y_ref, xn_ref) in cases.items():
        y, x_new = rel_lv_forward(x, g, A, steps=steps)
        y, x_new = jax.block_until_ready((y, x_new))
        assert jnp.allclose(y, y_ref, atol=1e-5, rtol=1e-5)
        assert jnp.allclose(x_new, xn_ref, atol=1e-5, rtol=1e-5)
        assert bool(jnp.all(jnp.isfinite(y)))

    print("KERNEL_OK")
</pallas_src>

<mosaic_0001>
module attributes {stable_mosaic.version = 11 : i64} {
  func.func @kernel(%arg0: i32, %arg1: memref<8x128xf32, #tpu.memory_space<vmem>>, %arg2: memref<128x128xf32, #tpu.memory_space<vmem>>, %arg3: memref<1x128xf32, #tpu.memory_space<vmem>>, %arg4: memref<8x128xf32, #tpu.memory_space<vmem>>, %arg5: memref<8x128xf32, #tpu.memory_space<vmem>>) attributes {dimension_semantics = [#tpu.dimension_semantics<parallel>], iteration_bounds = array<i64: 1>, scalar_prefetch = 0 : i64, scratch_operands = 0 : i64, tpu.core_type = #tpu.core_type<tc>, window_params = [{transform_indices = @transform_0, window_bounds = array<i64: 8, 128>}, {pipeline_mode = #tpu.pipeline_mode<synchronous>, transform_indices = @transform_1, window_bounds = array<i64: 128, 128>}, {pipeline_mode = #tpu.pipeline_mode<synchronous>, transform_indices = @transform_2, window_bounds = array<i64: 1, 128>}, {transform_indices = @transform_3, window_bounds = array<i64: 8, 128>}, {transform_indices = @transform_4, window_bounds = array<i64: 8, 128>}]} {
    %c0 = arith.constant 0 : index
    %c0_0 = arith.constant 0 : index
    %0 = vector.load %arg1[%c0, %c0_0] : memref<8x128xf32, #tpu.memory_space<vmem>>, vector<8x128xf32>
    %c0_1 = arith.constant 0 : index
    %c0_2 = arith.constant 0 : index
    %1 = vector.load %arg2[%c0_1, %c0_2] : memref<128x128xf32, #tpu.memory_space<vmem>>, vector<128x128xf32>
    %c0_3 = arith.constant 0 : index
    %c0_4 = arith.constant 0 : index
    %2 = vector.load %arg3[%c0_3, %c0_4] : memref<1x128xf32, #tpu.memory_space<vmem>>, vector<1x128xf32>
    %cst = arith.constant 1.000000e+00 : f32
    %3 = vector.broadcast %cst : f32 to vector<1x128xf32>
    %4 = arith.addf %2, %3 : vector<1x128xf32>
    %cst_5 = arith.constant dense<0.000000e+00> : vector<8x128xf32>
    %5 = tpu.matmul %0, %1, %cst_5 {dimension_numbers = #tpu.dot_dimension_numbers<[1], [0], [0], [1], [0, 0, 1, 1], [], []>} : vector<8x128xf32>, vector<128x128xf32>, vector<8x128xf32> -> vector<8x128xf32>
    %6 = vector.broadcast %4 : vector<1x128xf32> to vector<8x128xf32>
    %7 = arith.addf %5, %6 : vector<8x128xf32>
    %8 = arith.mulf %0, %7 : vector<8x128xf32>
    %c8_i32 = arith.constant 8 : i32
    %9 = arith.muli %arg0, %c8_i32 : i32
    %10 = tpu.iota {dimensions = array<i32: 0>} : vector<8x1xi32>
    %11 = vector.broadcast %9 : i32 to vector<8x1xi32>
    %12 = arith.addi %11, %10 : vector<8x1xi32>
    %c3_i32 = arith.constant 3 : i32
    %13 = vector.broadcast %c3_i32 : i32 to vector<8x1xi32>
    %14 = arith.cmpi slt, %12, %13 : vector<8x1xi32>
    %15 = vector.shape_cast %14 : vector<8x1xi1> to vector<8x1xi1>
    %16 = vector.broadcast %15 : vector<8x1xi1> to vector<8x128xi1>
    %17 = arith.select %16, %8, %0 : vector<8x128xi1>, vector<8x128xf32>
    %cst_6 = arith.constant dense<0.000000e+00> : vector<8xf32>
    %18 = vector.multi_reduction <add>, %17, %cst_6 [1] : vector<8x128xf32> to vector<8xf32>
    %19 = vector.shape_cast %18 : vector<8xf32> to vector<8x1xf32>
    %20 = tpu.reciprocal %19 : vector<8x1xf32> -> vector<8x1xf32>
    %c0_7 = arith.constant 0 : index
    %c0_8 = arith.constant 0 : index
    %21 = vector.load %arg5[%c0_7, %c0_8] : memref<8x128xf32, #tpu.memory_space<vmem>>, vector<8x128xf32>
    tpu.vector_store %arg5[%c0_7, %c0_8], %17 {strides = array<i32>} : memref<8x128xf32, #tpu.memory_space<vmem>>, vector<8x128xf32>,
    %22 = vector.broadcast %20 : vector<8x1xf32> to vector<8x128xf32>
    %23 = arith.mulf %17, %22 : vector<8x128xf32>
    %c0_9 = arith.constant 0 : index
    %c0_10 = arith.constant 0 : index
    %24 = vector.load %arg4[%c0_9, %c0_10] : memref<8x128xf32, #tpu.memory_space<vmem>>, vector<8x128xf32>
    tpu.vector_store %arg4[%c0_9, %c0_10], %23 {strides = array<i32>} : memref<8x128xf32, #tpu.memory_space<vmem>>, vector<8x128xf32>,
    return
  }
  func.func @transform_0(%arg0: i32) -> (i32, i32) {
    %c0_i32 = arith.constant 0 : i32
    %c0_i32_0 = arith.constant 0 : i32
    return %arg0, %c0_i32 : i32, i32
  }
  func.func @transform_1(%arg0: i32) -> (i32, i32) {
    %c0_i32 = arith.constant 0 : i32
    %c0_i32_0 = arith.constant 0 : i32
    %c0_i32_1 = arith.constant 0 : i32
    return %c0_i32, %c0_i32_0 : i32, i32
  }
  func.func @transform_2(%arg0: i32) -> (i32, i32) {
    %c0_i32 = arith.constant 0 : i32
    %c0_i32_0 = arith.constant 0 : i32
    %c0_i32_1 = arith.constant 0 : i32
    return %c0_i32, %c0_i32_0 : i32, i32
  }
  func.func @transform_3(%arg0: i32) -> (i32, i32) {
    %c0_i32 = arith.constant 0 : i32
    %c0_i32_0 = arith.constant 0 : i32
    return %arg0, %c0_i32 : i32, i32
  }
  func.func @transform_4(%arg0: i32) -> (i32, i32) {
    %c0_i32 = arith.constant 0 : i32
    %c0_i32_0 = arith.constant 0 : i32
    return %arg0, %c0_i32 : i32, i32
  }
}

</mosaic_0001>

<bundles_post_ra>
// kernel: tpu_custom_call.1
= control target key start
LH: loop header
LB: loop body
LE: loop exit
PB: predicated region body
PF: predicated region fallthrough
CT: control target
= control target key end

     0   :  { %10 = vsyncpa [#allocation3], 0  ;;  %s311_s0 = inlined_call_operand.hbm [shape: f32[8,128], index: 0, kind: input, shape index: {}, may-alias: {0,4}]   ;;  %s312_s1 = inlined_call_operand.hbm [shape: f32[128,128], index: 1, kind: input, shape index: {}]   ;;  %s313_s2 = inlined_call_operand.vmem [shape: f32[1,128], index: 2, kind: input, shape index: {}]   ;;  %s314_s3 = inlined_call_operand.hbm [shape: f32[8,128], index: 3, kind: output, shape index: {0}]   ;;  %s315_s4 = inlined_call_operand.hbm [shape: f32[8,128], index: 4, kind: output, shape index: {1}, may-alias: {0,4}]  }
   0x1   :  { %11 = vsyncpa [#allocation6], 0 }
   0x2   :  { %12 = vsyncpa [#allocation4], 0 }
   0x3   :  { %13 = vsyncpa [#allocation9], 0  ;;  %s19_s17 = sshll.u32 %s311_s0, 4  ;;  %s265_s18 = smov [#allocation2]   ;;  %s20_s17 = int_to_ptr.hbm [resolvable:$true] %s19_s17 }
   0x4   :  { %s21_s19 = sshll.u32 %s265_s18, 4  ;;  %s29_s22 = sshll.u32 %s312_s1, 4  ;;  %s22_s19 = int_to_ptr.vmem [resolvable:$true] %s21_s19  ;;  %s30_s22 = int_to_ptr.hbm [resolvable:$true] %s29_s22 }
   0x5   :  { %24 = dma.hbm_to_vmem [thread:$0]  %s20_s17, 128, %s22_s19, [#allocation3]  }
   0x6   :  { %s266_s23 = smov [#allocation5]   ;;  %s267_s25 = smov 128  }
   0x7   :  { %s31_s24 = sshll.u32 %s266_s23, 4  ;;  %s268_s26 = smov 8   ;;  %s32_s24 = int_to_ptr.vmem [resolvable:$true] %s31_s24 }
   0x8   :  { %37 = dma.hbm_to_vmem [thread:$0]  %s30_s22, 2048, %s32_s24, [#allocation6], %s267_s25, %s267_s25, %s268_s26  }
   0x9   :  { %257 = dma.done.wait [#allocation3], 128  }
   0xa   :  { %258 = vsyncadd [#allocation3], 4294967168 }
   0xb   :  { %259 = dma.done.wait [#allocation6], 2048  }
   0xc   :  { %260 = vsyncadd [#allocation6], 4294965248  ;;  %v64_v0 = vld [vmem:[#allocation5 + $0x78] sm:$0xff]  ;;  %v63_v1 = vld [vmem:[#allocation5 + $0x70] sm:$0xff]  ;;  %v92_v19 = vlaneseq  ;;  %s269_s27 = smov [#allocation8]   ;;  %s137_s5 = sshll.u32 %s315_s4, 4  ;;  %s138_s5 = int_to_ptr.hbm [resolvable:$true] %s137_s5 }
   0xd   :  { %70 = vmatpush.msra.mxu0 %v64_v0  ;;  %v62_v2 = vld [vmem:[#allocation5 + $0x68] sm:$0xff]  ;;  %v61_v3 = vld [vmem:[#allocation5 + $0x60] sm:$0xff]  ;;  %v60_v4 = vld [vmem:[#allocation5 + $0x58] sm:$0xff]  ;;  %s135_s28 = sshll.u32 %s269_s27, 4  ;;  %s126_s8 = sshll.u32 %s314_s3, 4  ;;  %s136_s28 = int_to_ptr.vmem [resolvable:$true] %s135_s28  ;;  %s127_s8 = int_to_ptr.hbm [resolvable:$true] %s126_s8 }
   0xe   :  { %v59_v5 = vld [vmem:[#allocation5 + $0x50] sm:$0xff]  ;;  %v58_v6 = vld [vmem:[#allocation5 + $0x48] sm:$0xff]  ;;  %v57_v7 = vld [vmem:[#allocation5 + $0x40] sm:$0xff]  ;;  %v93_v21 = vshrl.u32 %v92_v19, 7 }
   0xf   :  { %71 = vmatpush.msra.mxu0 %v63_v1  ;;  %v56_v8 = vld [vmem:[#allocation5 + $0x38] sm:$0xff]  ;;  %v55_v9 = vld [vmem:[#allocation5 + $0x30] sm:$0xff]  ;;  %v54_v10 = vld [vmem:[#allocation5 + $0x28] sm:$0xff] }
  0x10   :  { %v53_v11 = vld [vmem:[#allocation5 + $0x20] sm:$0xff]  ;;  %v52_v12 = vld [vmem:[#allocation5 + $0x18] sm:$0xff]  ;;  %v51_v13 = vld [vmem:[#allocation5 + $0x10] sm:$0xff]  ;;  %vm96_vm0 = vcmp.lt.s32.totalorder %v93_v21, 3 }
  0x11   :  { %72 = vmatpush.msra.mxu0 %v62_v2  ;;  %v50_v14 = vld [vmem:[#allocation5 + $0x8] sm:$0xff]  ;;  %v49_v15 = vld [vmem:[#allocation5] sm:$0xff]  ;;  %v48_v16 = vld [vmem:[#allocation2] sm:$0xff] }
  0x12   :  { %v65_v17 = vld [vmem:[%s313_s2] sm:$0x1]  ;;  %s270_s2 = smov [#allocation7]  }
  0x13   :  { %73 = vmatpush.msra.mxu0 %v61_v3  ;;  %v66_v18 = vadd.f32 1.0, %v65_v17  ;;  %s124_s6 = sshll.u32 %s270_s2, 4  ;;  %s125_s6 = int_to_ptr.vmem [resolvable:$true] %s124_s6 }
  0x15   :  { %74 = vmatpush.msra.mxu0 %v60_v4  ;;  %v68_v20 = vperm.slane %v66_v18, 0 }
  0x17   :  { %75 = vmatpush.msra.mxu0 %v59_v5 }
  0x19   :  { %76 = vmatpush.msra.mxu0 %v58_v6 }
  0x1b   :  { %77 = vmatpush.msra.mxu0 %v57_v7 }
  0x1d   :  { %78 = vmatpush.msra.mxu0 %v56_v8 }
  0x1f   :  { %79 = vmatpush.msra.mxu0 %v55_v9 }
  0x21   :  { %80 = vmatpush.msra.mxu0 %v54_v10 }
  0x23   :  { %81 = vmatpush.msra.mxu0 %v53_v11 }
  0x25   :  { %82 = vmatpush.msra.mxu0 %v52_v12 }
  0x27   :  { %83 = vmatpush.msra.mxu0 %v51_v13 }
  0x29   :  { %84 = vmatpush.msra.mxu0 %v50_v14 }
  0x2b   :  { %85 = vmatpush.msra.mxu0 %v49_v15 }
  0x2c   :  { %86 = vmatmul.f32.vlgmr.msra.gmra.mxu0 %v48_v16 }
  0xa9   :  { %v87_v22 = vpop.f32.mrf.mxu0 }
  0xaa   :  { %v88_v23 = vadd.f32 %v87_v22, %v68_v20 }
  0xac   :  { %v90_v24 = vmul.f32 %v88_v23, %v48_v16 }
  0xae   :  { %v99_v25 = vsel %vm96_vm0, %v90_v24, %v48_v16 }
  0xaf   :  { %100 = vadd.xlane.f32.xlu0 %v99_v25  ;;  %116 = vst [vmem:[#allocation8] sm:$0xff] %v99_v25 }
  0xb0   :  { %140 = dma.vmem_to_hbm [thread:$0]  %s136_s28, 128, %s138_s5, [#allocation9]  }
 0x122   :  { %v101_v26 = vpop.xlane.xlu0 %100 }
 0x123   :  { %159 = vrcp.f32 %v101_v26  ;;  %v113_v30 = vand.u32 2147483648, %v101_v26  ;;  %v111_v32 = vand.u32 2147483647, %v101_v26  ;;  %vm107_vm2 = vweird.f32 %v101_v26 }
 0x125   :  { %v114_v34 = vor.u32 1.1754944e-38, %v113_v30  ;;  %vm112_vm4 = vcmp.eq.f32.partialorder %v111_v32, 8.507059e+37 }
 0x129   :  { %v160_v27 = vpop.eup %159 }
 0x12a   :  { %v103_v28 = vmul.f32 %v160_v27, %v101_v26  ;;  %vm108_vm1 = vweird.f32 %v160_v27 }
 0x12b   :  { %vm109_vm3 = vmor %vm107_vm2, %vm108_vm1 }
 0x12c   :  { %v104_v29 = vsub.f32 1.0, %v103_v28 }
 0x12e   :  { %v105_v31 = vmul.f32 %v160_v27, %v104_v29 }
 0x130   :  { %v106_v33 = vadd.f32 %v160_v27, %v105_v31 }
 0x132   :  { %v110_v35 = vsel %vm109_vm3, %v160_v27, %v106_v33 }
 0x133   :  { %v115_v36 = vsel %vm112_vm4, %v114_v34, %v110_v35 }
 0x134   :  { %v117_v37 = vmul.f32 %v115_v36, %v99_v25 }
 0x136   :  { %118 = vst [vmem:[#allocation7] sm:$0xff] %v117_v37 }
 0x137   :  { %129 = dma.vmem_to_hbm [thread:$0]  %s125_s6, 128, %s127_s8, [#allocation4]  }
 0x138   :  { %261 = dma.done.wait [#allocation4], 128  }
 0x139   :  { %262 = vsyncadd [#allocation4], 4294967168 }
 0x13a   :  { %263 = dma.done.wait [#allocation9], 128  }
 0x13b   :  { %264 = vsyncadd [#allocation9], 4294967168 }
 0x13c   :  { %149 = vsyncpa [#allocation3], 1 }
 0x13d   :  { %150 = vsyncpa [#allocation6], 1 }
 0x13e   :  { %151 = vsyncpa [#allocation4], 1 }
 0x13f   :  { %152 = vsyncpa [#allocation9], 1 }

</bundles_post_ra>
